<compile_context>
chip_gen: v7x
topology: tpu7x:2x2x1
jax: 0.10.0
libtpu: 0.0.40
codegen_flags: <defaults>
</compile_context>

<pallas_src>
from math import sqrt

import jax
import jax.numpy as jnp
from jax.experimental import pallas as pl
from jax.experimental.pallas import tpu as pltpu


def _round_up(x, m):
    return ((x + m - 1) // m) * m


# ---------------------------------------------------------------------------
# Tiled linear kernel: y = x @ Wt + b   (Wt pre-transposed to (Din, Dout))
# ---------------------------------------------------------------------------
def _linear_kernel(x_ref, wt_ref, b_ref, o_ref, acc_ref):
    @pl.when(pl.program_id(2) == 0)
    def _():
        acc_ref[...] = jnp.zeros_like(acc_ref)

    acc_ref[...] += jnp.dot(x_ref[...], wt_ref[...],
                            preferred_element_type=jnp.float32)

    @pl.when(pl.program_id(2) == pl.num_programs(2) - 1)
    def _():
        o_ref[...] = (acc_ref[...] + b_ref[...]).astype(o_ref.dtype)


def pallas_linear(x, wt, b, *, tm=256, tn=256, tk=512):
    """x: (M, K), wt: (K, N) (already transposed), b: (1, N) -> (M, N)."""
    M, K = x.shape
    _, N = wt.shape
    # Tile = full dim when small (always legal), else an aligned tile
    # (tm mult of 8; tn/tk mult of 128, 256-friendly for v6e/v7x MXU).
    tm = M if M <= tm else tm
    tk = K if K <= tk else tk
    tn = N if N <= tn else tn
    Mp, Kp, Np = _round_up(M, tm), _round_up(K, tk), _round_up(N, tn)
    if (Mp, Kp) != (M, K):
        x = jnp.pad(x, ((0, Mp - M), (0, Kp - K)))
    if (Kp, Np) != (K, N):
        wt = jnp.pad(wt, ((0, Kp - K), (0, Np - N)))
    if Np != N:
        b = jnp.pad(b, ((0, 0), (0, Np - N)))

    out = pl.pallas_call(
        _linear_kernel,
        out_shape=jax.ShapeDtypeStruct((Mp, Np), jnp.float32),
        grid=(Mp // tm, Np // tn, Kp // tk),
        in_specs=[
            pl.BlockSpec((tm, tk), lambda i, j, k: (i, k)),
            pl.BlockSpec((tk, tn), lambda i, j, k: (k, j)),
            pl.BlockSpec((1, tn), lambda i, j, k: (0, j)),
        ],
        out_specs=pl.BlockSpec((tm, tn), lambda i, j, k: (i, j)),
        scratch_shapes=[pltpu.VMEM((tm, tn), jnp.float32)],
        compiler_params=pltpu.CompilerParams(
            dimension_semantics=("parallel", "parallel", "arbitrary")),
    )(x, wt, b)

    if (Mp, Np) != (M, N):
        out = out[:M, :N]
    return out


# ---------------------------------------------------------------------------
# Fused kernel: Q-projection + multi-head cross attention + output projection
# One (batch, L-tile) per grid step; heads are fused inside (lane-dense I/O).
# ---------------------------------------------------------------------------
def _make_fused_attn_kernel(n_heads, d_keys, scale):
    def kernel(x_ref, wqt_ref, bq_ref, k_ref, v_ref, wot_ref, bo_ref,
               o_ref, attn_ref):
        # Q projection with the 1/sqrt(E) scale folded into Q (L*D muls
        # instead of H*L*S muls on the scores).
        q_all = (jnp.dot(x_ref[...], wqt_ref[...],
                         preferred_element_type=jnp.float32)
                 + bq_ref[...]) * scale                    # (tl, H*E)
        k_all = k_ref[...]                                 # (S, H*E)
        v_all = v_ref[...]                                 # (S, H*E)

        # Per-head attention; static loop unrolled at trace time.
        for h in range(n_heads):
            lo, hi = h * d_keys, (h + 1) * d_keys
            qh = q_all[:, lo:hi]                           # (tl, E)
            kh = k_all[:, lo:hi]                           # (S, E)
            vh = v_all[:, lo:hi]                           # (S, E)
            # Q K^T without materializing a transpose of K.
            s = jax.lax.dot_general(qh, kh, (((1,), (1,)), ((), ())),
                                    preferred_element_type=jnp.float32)
            m = jnp.max(s, axis=-1, keepdims=True)
            p = jnp.exp(s - m)
            a = p * pl.reciprocal(jnp.sum(p, axis=-1, keepdims=True),
                                  approx=True)
            # TODO(synk): train-mode attention dropout (p=0.1) would go here.
            attn_ref[:, lo:hi] = jnp.dot(a, vh,
                                         preferred_element_type=jnp.float32)

        # Output projection -> lane-dense (tl, d_llm) block.
        y = jnp.dot(attn_ref[...], wot_ref[...],
                    preferred_element_type=jnp.float32) + bo_ref[...]
        o_ref[...] = y.astype(o_ref.dtype)

    return kernel


def pallas_fused_attention(x, wq_t, bq, k, v, wo_t, bo, *, n_heads,
                           tl_pref=128):
    B, L, d_model = x.shape
    S, D = k.shape
    d_llm = wo_t.shape[1]
    E = D // n_heads
    scale = 1.0 / sqrt(E)

    tl = L if L <= tl_pref else tl_pref
    Lp = _round_up(L, tl)
    if Lp != L:
        x = jnp.pad(x, ((0, 0), (0, Lp - L), (0, 0)))

    out = pl.pallas_call(
        _make_fused_attn_kernel(n_heads, E, scale),
        out_shape=jax.ShapeDtypeStruct((B, Lp, d_llm), jnp.float32),
        grid=(B, Lp // tl),
        in_specs=[
            pl.BlockSpec((None, tl, d_model), lambda b, l: (b, l, 0)),  # x
            pl.BlockSpec((d_model, D), lambda b, l: (0, 0)),            # Wq^T
            pl.BlockSpec((1, D), lambda b, l: (0, 0)),                  # bq
            pl.BlockSpec((S, D), lambda b, l: (0, 0)),                  # K
            pl.BlockSpec((S, D), lambda b, l: (0, 0)),                  # V
            pl.BlockSpec((D, d_llm), lambda b, l: (0, 0)),              # Wo^T
            pl.BlockSpec((1, d_llm), lambda b, l: (0, 0)),              # bo
        ],
        out_specs=pl.BlockSpec((None, tl, d_llm), lambda b, l: (b, l, 0)),
        scratch_shapes=[pltpu.VMEM((tl, D), jnp.float32)],
        compiler_params=pltpu.CompilerParams(
            dimension_semantics=("parallel", "parallel")),
    )(x, wq_t, bq, k, v, wo_t, bo)

    if Lp != L:
        out = out[:, :L, :]
    return out


# ---------------------------------------------------------------------------
# Full ReprogrammingLayer forward
# ---------------------------------------------------------------------------
def reprogramming_layer_forward(params, target_embedding, source_embedding,
                                value_embedding, n_heads):
    B, L, d_model = target_embedding.shape
    S, d_llm = source_embedding.shape
    D = params["wq"].shape[0]          # n_heads * d_keys

    # Pre-transpose weights once (feed the MXU without in-kernel transposes)
    # and reshape biases to lane-major (1, Dout).
    wq_t = params["wq"].T              # (d_model, D)
    wk_t = params["wk"].T              # (d_llm, D)
    wv_t = params["wv"].T              # (d_llm, D)
    wo_t = params["wo"].T              # (D, d_llm)
    bq = params["bq"].reshape(1, D)
    bk = params["bk"].reshape(1, D)
    bv = params["bv"].reshape(1, D)
    bo = params["bo"].reshape(1, d_llm)

    # Batch-independent K / V projections (tiled + pipelined matmuls).
    k = pallas_linear(source_embedding, wk_t, bk)   # (S, D)
    v = pallas_linear(value_embedding, wv_t, bv)    # (S, D)

    # Fused Q-projection + attention + output projection.
    return pallas_fused_attention(target_embedding, wq_t, bq, k, v, wo_t, bo,
                                  n_heads=n_heads)            # (B, L, d_llm)


# ---------------------------------------------------------------------------
# Pure-JAX reference (for verification)
# ---------------------------------------------------------------------------
def reference_forward(params, target_embedding, source_embedding,
                      value_embedding, n_heads):
    B, L, _ = target_embedding.shape
    S, _ = source_embedding.shape
    H = n_heads

    with jax.default_matmul_precision("highest"):
        q = target_embedding @ params["wq"].T + params["bq"]
        k = source_embedding @ params["wk"].T + params["bk"]
        v = value_embedding @ params["wv"].T + params["bv"]

        E = q.shape[-1] // H
        q = q.reshape(B, L, H, E)
        k = k.reshape(S, H, E)
        v = v.reshape(S, H, E)

        scale = 1.0 / sqrt(E)
        scores = jnp.einsum("blhe,she->bhls", q, k)
        a = jax.nn.softmax(scale * scores, axis=-1)
        out = jnp.einsum("bhls,she->blhe", a, v).reshape(B, L, -1)
        return out @ params["wo"].T + params["bo"]


# ---------------------------------------------------------------------------
def init_params(key, d_model, n_heads, d_llm, d_keys=None):
    d_keys = d_keys or d_model // n_heads
    dk = d_keys * n_heads

    def linear_init(k, out_f, in_f):
        kw, kb = jax.random.split(k)
        bound = 1.0 / sqrt(in_f)
        w = jax.random.uniform(kw, (out_f, in_f), jnp.float32, -bound, bound)
        b = jax.random.uniform(kb, (out_f,), jnp.float32, -bound, bound)
        return w, b

    kq, kk, kv, ko = jax.random.split(key, 4)
    wq, bq = linear_init(kq, dk, d_model)
    wk, bk = linear_init(kk, dk, d_llm)
    wv, bv = linear_init(kv, dk, d_llm)
    wo, bo = linear_init(ko, d_llm, dk)
    return dict(wq=wq, bq=bq, wk=wk, bk=bk, wv=wv, bv=bv, wo=wo, bo=bo)


if __name__ == "__main__":
    # Small shapes consistent with the module's forward signature.
    B, L, S = 2, 8, 16
    d_model, n_heads, d_llm = 32, 4, 64   # d_keys = d_model // n_heads = 8

    key = jax.random.PRNGKey(0)
    kp, kt, ks, kv = jax.random.split(key, 4)

    params = init_params(kp, d_model, n_heads, d_llm)
    target_embedding = jax.random.normal(kt, (B, L, d_model), jnp.float32)
    source_embedding = jax.random.normal(ks, (S, d_llm), jnp.float32)
    value_embedding = jax.random.normal(kv, (S, d_llm), jnp.float32)

    out = reprogramming_layer_forward(params, target_embedding,
                                      source_embedding, value_embedding,
                                      n_heads)
    out = jax.block_until_ready(out)

    ref = reference_forward(params, target_embedding, source_embedding,
                            value_embedding, n_heads)
    assert out.shape == (B, L, d_llm)
    # Tolerance accounts for the EUP approx reciprocal in the softmax denom.
    assert jnp.allclose(out, ref, rtol=1e-2, atol=1e-2), "mismatch vs reference"

    print("KERNEL_OK")
</pallas_src>

<mosaic_0001>
module attributes {stable_mosaic.version = 11 : i64} {
  func.func @_linear_kernel(%arg0: i32, %arg1: i32, %arg2: i32, %arg3: memref<16x64xf32, #tpu.memory_space<vmem>>, %arg4: memref<64x32xf32, #tpu.memory_space<vmem>>, %arg5: memref<1x32xf32, #tpu.memory_space<vmem>>, %arg6: memref<16x32xf32, #tpu.memory_space<vmem>>, %arg7: memref<16x32xf32, #tpu.memory_space<vmem>>) attributes {dimension_semantics = [#tpu.dimension_semantics<parallel>, #tpu.dimension_semantics<parallel>, #tpu.dimension_semantics<arbitrary>], iteration_bounds = array<i64: 1, 1, 1>, scalar_prefetch = 0 : i64, scratch_operands = 1 : i64, tpu.core_type = #tpu.core_type<tc>, window_params = [{transform_indices = @transform_0, window_bounds = array<i64: 16, 64>}, {transform_indices = @transform_1, window_bounds = array<i64: 64, 32>}, {transform_indices = @transform_2, window_bounds = array<i64: 1, 32>}, {transform_indices = @transform_3, window_bounds = array<i64: 16, 32>}]} {
    %c0_i32 = arith.constant 0 : i32
    %0 = arith.cmpi eq, %arg2, %c0_i32 : i32
    %1 = arith.extui %0 : i1 to i32
    %c0_i32_0 = arith.constant 0 : i32
    %2 = arith.cmpi ne, %1, %c0_i32_0 : i32
    scf.if %2 {
      %cst_10 = arith.constant 0.000000e+00 : f32
      %12 = vector.broadcast %cst_10 : f32 to vector<16x32xf32>
      %c0_11 = arith.constant 0 : index
      %c0_12 = arith.constant 0 : index
      %13 = vector.load %arg7[%c0_11, %c0_12] : memref<16x32xf32, #tpu.memory_space<vmem>>, vector<16x32xf32>
      tpu.vector_store %arg7[%c0_11, %c0_12], %12 {strides = array<i32>} : memref<16x32xf32, #tpu.memory_space<vmem>>, vector<16x32xf32>,
    } else {
    }
    %c0 = arith.constant 0 : index
    %c0_1 = arith.constant 0 : index
    %3 = vector.load %arg7[%c0, %c0_1] : memref<16x32xf32, #tpu.memory_space<vmem>>, vector<16x32xf32>
    %c0_2 = arith.constant 0 : index
    %c0_3 = arith.constant 0 : index
    %4 = vector.load %arg3[%c0_2, %c0_3] : memref<16x64xf32, #tpu.memory_space<vmem>>, vector<16x64xf32>
    %c0_4 = arith.constant 0 : index
    %c0_5 = arith.constant 0 : index
    %5 = vector.load %arg4[%c0_4, %c0_5] : memref<64x32xf32, #tpu.memory_space<vmem>>, vector<64x32xf32>
    %cst = arith.constant dense<0.000000e+00> : vector<16x32xf32>
    %6 = tpu.matmul %4, %5, %cst {dimension_numbers = #tpu.dot_dimension_numbers<[1], [0], [0], [1], [0, 0, 1, 1], [], []>} : vector<16x64xf32>, vector<64x32xf32>, vector<16x32xf32> -> vector<16x32xf32>
    %7 = arith.addf %3, %6 : vector<16x32xf32>
    %c0_6 = arith.constant 0 : index
    %c0_7 = arith.constant 0 : index
    %8 = vector.load %arg7[%c0_6, %c0_7] : memref<16x32xf32, #tpu.memory_space<vmem>>, vector<16x32xf32>
    tpu.vector_store %arg7[%c0_6, %c0_7], %7 {strides = array<i32>} : memref<16x32xf32, #tpu.memory_space<vmem>>, vector<16x32xf32>,
    %c0_i32_8 = arith.constant 0 : i32
    %9 = arith.cmpi eq, %arg2, %c0_i32_8 : i32
    %10 = arith.extui %9 : i1 to i32
    %c0_i32_9 = arith.constant 0 : i32
    %11 = arith.cmpi ne, %10, %c0_i32_9 : i32
    scf.if %11 {
      %c0_10 = arith.constant 0 : index
      %c0_11 = arith.constant 0 : index
      %12 = vector.load %arg7[%c0_10, %c0_11] : memref<16x32xf32, #tpu.memory_space<vmem>>, vector<16x32xf32>
      %c0_12 = arith.constant 0 : index
      %c0_13 = arith.constant 0 : index
      %13 = vector.load %arg5[%c0_12, %c0_13] : memref<1x32xf32, #tpu.memory_space<vmem>>, vector<1x32xf32>
      %14 = vector.broadcast %13 : vector<1x32xf32> to vector<16x32xf32>
      %15 = arith.addf %12, %14 : vector<16x32xf32>
      %c0_14 = arith.constant 0 : index
      %c0_15 = arith.constant 0 : index
      %16 = vector.load %arg6[%c0_14, %c0_15] : memref<16x32xf32, #tpu.memory_space<vmem>>, vector<16x32xf32>
      tpu.vector_store %arg6[%c0_14, %c0_15], %15 {strides = array<i32>} : memref<16x32xf32, #tpu.memory_space<vmem>>, vector<16x32xf32>,
    } else {
    }
    return
  }
  func.func @transform_0(%arg0: i32, %arg1: i32, %arg2: i32) -> (i32, i32) {
    %c0_i32 = arith.constant 0 : i32
    return %arg0, %arg2 : i32, i32
  }
  func.func @transform_1(%arg0: i32, %arg1: i32, %arg2: i32) -> (i32, i32) {
    %c0_i32 = arith.constant 0 : i32
    return %arg2, %arg1 : i32, i32
  }
  func.func @transform_2(%arg0: i32, %arg1: i32, %arg2: i32) -> (i32, i32) {
    %c0_i32 = arith.constant 0 : i32
    %c0_i32_0 = arith.constant 0 : i32
    return %c0_i32, %arg1 : i32, i32
  }
  func.func @transform_3(%arg0: i32, %arg1: i32, %arg2: i32) -> (i32, i32) {
    %c0_i32 = arith.constant 0 : i32
    return %arg0, %arg1 : i32, i32
  }
}

</mosaic_0001>

<bundles_post_ra>
// kernel: tpu_custom_call.1
= control target key start
LH: loop header
LB: loop body
LE: loop exit
PB: predicated region body
PF: predicated region fallthrough
CT: control target
= control target key end

     0   :  { %vm34_vm0 = vcmask 523264   ;;  %vm19_vm1 = vcmask 261120   ;;  %v229_v5 = vmov 0.0   ;;  %s306_s0 = inlined_call_operand.vmem [shape: f32[16,64], index: 0, kind: input, shape index: {}]   ;;  %s307_s1 = inlined_call_operand.vmem [shape: f32[64,32], index: 1, kind: input, shape index: {}]   ;;  %s308_s2 = inlined_call_operand.vmem [shape: f32[1,32], index: 2, kind: input, shape index: {}]   ;;  %s309_s3 = inlined_call_operand.hbm [shape: f32[16,32], index: 3, kind: output, shape index: {}]  }
   0x1   :  { %v26_v0 = vld [vmem:[%s307_s1] sm:$0xff]  ;;  %v27_v1 = vld [vmem:[%s307_s1 + $0x8] sm:$0xff]  ;;  %v28_v2 = vld [vmem:[%s307_s1 + $0x10] sm:$0xff]  ;;  %21 = vst.msk [vmem:[#allocation2 + $0x8] sm:$0xff] %vm19_vm1, %v229_v5 }
   0x2   :  { %v185_v3 = vpack.c.bf16 %v27_v1, %v26_v0  ;;  %v29_v4 = vld [vmem:[%s307_s1 + $0x18] sm:$0xff]  ;;  %20 = vst.msk [vmem:[#allocation2] sm:$0xff] %vm19_vm1, %v229_v5  ;;  %v30_v7 = vld [vmem:[%s307_s1 + $0x20] sm:$0xff]  ;;  %v31_v8 = vld [vmem:[%s307_s1 + $0x28] sm:$0xff] }
   0x3   :  { %v189_v6 = vpack.c.bf16 %v29_v4, %v28_v2  ;;  %v24_v9 = vld [vmem:[%s306_s0] sm:$0xff] }
   0x4   :  { %186 = vmatprep.subr.bf16.mxu0 %v185_v3  ;;  %182 = vmatprep.mubr.msk.f32.mxu0 %vm34_vm0, %v24_v9 }
   0x5   :  { %8 = vsyncpa [#allocation4], 0  ;;  %188 = vmatpush3.bf16.msra.mxu0 %v185_v3  ;;  %v193_v10 = vpack.c.bf16 %v31_v8, %v30_v7  ;;  %v32_v11 = vld [vmem:[%s307_s1 + $0x30] sm:$0xff]  ;;  %v33_v12 = vld [vmem:[%s307_s1 + $0x38] sm:$0xff]  ;;  %s230_s6 = smov [#allocation3]  }
   0x6   :  { %190 = vmatprep.subr.bf16.mxu0 %v189_v6  ;;  %v197_v13 = vpack.c.bf16 %v33_v12, %v32_v11  ;;  %v25_v14 = vld [vmem:[%s306_s0 + $0x8] sm:$0xff]  ;;  %v155_v21 = vld [vmem:[%s308_s2] ss:$0 sm:$0xff]  ;;  %s142_s7 = sshll.u32 %s230_s6, 4  ;;  %s143_s7 = int_to_ptr.vmem [resolvable:$true] %s142_s7 }
   0x7   :  { %s205_s0 = scalar_lea.vmem %s143_s7, 256  ;;  %p210_p1 = scmp.lt.s32.totalorder %s143_s7, %s143_s7 }
   0x8   :  { %v23_v15 = vld [vmem:[#allocation2 + $0x8] sm:$0xff]  ;;  %p206_p0 = scmp.ne.s32.totalorder %s143_s7, %s205_s0  ;;  %p211_p2 = scmp.lt.s32.totalorder %s205_s0, %s205_s0 }
   0x9   :  { %192 = vmatpush3.bf16.msra.mxu0 %v189_v6  ;;  %v22_v16 = vld [vmem:[#allocation2] sm:$0xff] }
   0xa   :  { %194 = vmatprep.subr.bf16.mxu0 %v193_v10  ;;  %p212_p3 = por %p211_p2, %p210_p1 }
   0xc   :  { %p213_p4 = pnand %p212_p3, %p206_p0 }
   0xd   :  { %196 = vmatpush3.bf16.msra.mxu0 %v193_v10 }
   0xe   :  { %198 = vmatprep.subr.bf16.mxu0 %v197_v13 }
  0x11   :  { %200 = vmatpush3.bf16.msra.mxu0 %v197_v13 }
  0x14   :  { %183 = vmatmul.mubr.msk.f32.vlgmr.msra.gmra.mrb[0].mxu0 %vm34_vm0, %v25_v14 }
  0xe7   :  { %v184_v17 = vpop.f32.mrb[0].mxu0 }
  0xe8   :  { %v117_v18 = vadd.f32 %v184_v17, %v23_v15  ;;  %v107_v19 = vpop.f32.mrb[1].mxu0 }
  0xe9   :  { %v116_v20 = vadd.f32 %v107_v19, %v22_v16 }
  0xea   :  { %120 = vst.msk [vmem:[#allocation2 + $0x8] sm:$0xff] %vm19_vm1, %v117_v18 }
  0xeb   :  { %119 = vst.msk [vmem:[#allocation2] sm:$0xff] %vm19_vm1, %v116_v20 }
  0xf1   :  { %v125_v22 = vld [vmem:[#allocation2 + $0x8] sm:$0xff] }
  0xf2   :  { %v124_v23 = vld [vmem:[#allocation2] sm:$0xff]  ;;  %v134_v24 = vadd.f32 %v155_v21, %v125_v22 }
  0xf3   :  { %v133_v25 = vadd.f32 %v155_v21, %v124_v23 }
  0xf4   :  { %136 = vst.msk [vmem:[#allocation3 + $0x8] sm:$0xff] %vm19_vm1, %v134_v24 }
  0xf5   :  { %135 = vst.msk [vmem:[#allocation3] sm:$0xff] %vm19_vm1, %v133_v25 }
  0xf6   :  { %216 = shalt.err (!%p213_p4)
}
  0xf7   :  { %s217_s9 = scalar_lea.hbm %s309_s3, 256 }
  0xf8   :  { %p218_p5 = scmp.ne.s32.totalorder %s309_s3, %s217_s9  ;;  %p221_p6 = scmp.lt.u32.totalorder %s217_s9, %s309_s3 }
  0xfa   :  { %p223_p7 = pnand %p221_p6, %p218_p5 }
  0xfc   :  { %226 = shalt.err (!%p223_p7)
}
  0xfd   :  { %s231_s14 = smov 128   ;;  %s232_s15 = smov 8  }
  0xfe   :  { %148 = dma.vmem_to_hbm [thread:$0]  %s143_s7, 256, %s309_s3, [#allocation4], %s231_s14, %s231_s14, %s232_s15  }
  0xff   :  { %227 = dma.done.wait [#allocation4], 256  }
 0x100   :  { %228 = vsyncadd [#allocation4], 4294967040 }
 0x101   :  { %152 = vsyncpa [#allocation4], 1 }

</bundles_post_ra>
